<compile_context>
chip_gen: v7x
topology: tpu7x:2x2x1
jax: 0.10.0
libtpu: 0.0.40
codegen_flags: <defaults>
</compile_context>

<pallas_src>
import jax
import jax.numpy as jnp
from jax.experimental import pallas as pl
from jax.experimental.pallas import tpu as pltpu


def _ged_relu_kernel(x_ref, o_ref):
    # Elementwise ReLU on the whole VMEM tile (VPU); scalar zero constant.
    o_ref[...] = jnp.maximum(x_ref[...], 0)


# ~4 MiB per buffer: 2 in + 2 out double-buffers = 16 MiB live, well under the
# 40 MiB scoped-VMEM limit we request below on every chip generation.
_TARGET_TILE_BYTES = 4 * 1024 * 1024
_VMEM_LIMIT_BYTES = 40 * 1024 * 1024
_MAX_LANE = 8192


def _sublane_multiple(dtype) -> int:
    # Packed native tile heights: f32 -> 8, bf16/f16 -> 16, int8/fp8 -> 32.
    itemsize = jnp.dtype(dtype).itemsize
    if itemsize >= 4:
        return 8
    if itemsize == 2:
        return 16
    return 32


def _pick_lane(total: int) -> int | None:
    """Largest multiple of 128 (<= _MAX_LANE) that divides total, else None."""
    for cand in range(_MAX_LANE, 127, -128):
        if total % cand == 0:
            return cand
    return None


def ged_relu_forward(x, S_n_n=None, S_n_p=None, Gi=None, l=0.01, k1=1, k2=1,
                     p=1.0, alias_input=False):
    """Forward of GEDReLU == relu(x). S_n_n/S_n_p/Gi/l/k1/k2/p only matter for backward."""
    orig_shape = x.shape
    dtype = x.dtype
    total = int(x.size)
    if total == 0:
        return x

    lane = _pick_lane(total)
    if lane is None:
        # Element count not a multiple of 128: a lone ReLU is HBM-bound and XLA
        # already hits roofline; padding + slicing would only add HBM traffic.
        return jnp.maximum(x, 0)

    rows = total // lane
    x2d = x.reshape(rows, lane)

    # Tile rows so one (tr, lane) buffer is ~4 MiB; tr is a multiple of the
    # dtype's packed sublane count so edge tiles stay on the native layout.
    itemsize = jnp.dtype(dtype).itemsize
    sub = _sublane_multiple(dtype)
    tr = max(1, _TARGET_TILE_BYTES // (lane * itemsize))
    tr = max(sub, (tr // sub) * sub)
    if rows <= sub:
        tr = rows              # full array in one block (exempt from (8,128) rule)
    else:
        rows_rounded = ((rows + sub - 1) // sub) * sub
        tr = min(tr, rows_rounded)

    grid = (pl.cdiv(rows, tr),)

    out2d = pl.pallas_call(
        _ged_relu_kernel,
        out_shape=jax.ShapeDtypeStruct((rows, lane), dtype),
        grid=grid,
        in_specs=[pl.BlockSpec((tr, lane), lambda i: (i, 0))],
        out_specs=pl.BlockSpec((tr, lane), lambda i: (i, 0)),
        compiler_params=pltpu.CompilerParams(
            # Independent elementwise tiles -> shard across both TCs on v7x.
            dimension_semantics=("parallel",),
            # Raise the scoped-VMEM limit so 4 x 4 MiB buffers fit on v5e too.
            vmem_limit_bytes=_VMEM_LIMIT_BYTES,
        ),
        cost_estimate=pl.CostEstimate(
            flops=total,
            transcendentals=0,
            bytes_accessed=2 * total * itemsize,
        ),
        input_output_aliases=({0: 0} if alias_input else {}),
    )(x2d)

    return out2d.reshape(orig_shape)


class GEDReLUPallas:
    """JAX/Pallas analogue of the PyTorch GEDReLU module (forward only)."""

    def __init__(self, shape=None, l=0.01, k1=1, k2=1, p=1.0, dtype=jnp.float32):
        self.l = l
        self.k1 = k1
        self.k2 = k2
        self.p = p
        self.is_GED = True
        if shape is not None:
            # Deterministic init matching torch.zeros(shape) in the module.
            self.S_n_n = jnp.zeros(shape, dtype)
            self.S_n_p = jnp.zeros(shape, dtype)
            self.Gi = jnp.zeros(shape, dtype)
        else:
            self.S_n_n = None
            self.S_n_p = None
            self.Gi = None

    def __call__(self, x):
        # NOTE: lazy param creation mutates Python state; prefer passing `shape`
        # at construction time if this module will be used under jax.jit/vmap.
        if self.S_n_n is None:
            shape = x.shape[1:]
            self.S_n_n = jnp.zeros(shape, x.dtype)
            self.S_n_p = jnp.zeros(shape, x.dtype)
            self.Gi = jnp.zeros(shape, x.dtype)
        return ged_relu_forward(
            x, self.S_n_n, self.S_n_p, self.Gi, self.l, self.k1, self.k2, self.p
        )


if __name__ == "__main__":
    key = jax.random.PRNGKey(0)

    # Small NCHW input consistent with a conv-activation use of GEDReLU.
    x = jax.random.normal(key, (2, 4, 16, 16), dtype=jnp.float32)
    module = GEDReLUPallas()  # lazily creates zero params of shape (4, 16, 16)
    out = jax.block_until_ready(module(x))
    ref = jnp.maximum(x, 0.0)
    assert out.shape == x.shape and out.dtype == x.dtype
    assert bool(jnp.allclose(out, ref, atol=0.0, rtol=0.0))

    # Wide-lane path (total divisible by 8192 -> lane = 8192).
    x_wide = jax.random.normal(jax.random.PRNGKey(1), (2, 4, 32, 64), dtype=jnp.float32)
    out_wide = jax.block_until_ready(ged_relu_forward(x_wide))
    assert bool(jnp.allclose(out_wide, jnp.maximum(x_wide, 0.0), atol=0.0, rtol=0.0))

    # Non-divisible element count -> plain XLA fallback path (no pad/slice).
    x_odd = jax.random.normal(jax.random.PRNGKey(2), (2, 3, 7, 5), dtype=jnp.float32)
    out_odd = jax.block_until_ready(ged_relu_forward(x_odd))
    assert out_odd.shape == x_odd.shape and out_odd.dtype == x_odd.dtype
    assert bool(jnp.allclose(out_odd, jnp.maximum(x_odd, 0.0), atol=0.0, rtol=0.0))

    print("KERNEL_OK")
</pallas_src>

<mosaic_0001>
module attributes {stable_mosaic.version = 11 : i64} {
  func.func @_ged_relu_kernel(%arg0: i32, %arg1: memref<1x2048xf32, #tpu.memory_space<vmem>>, %arg2: memref<1x2048xf32, #tpu.memory_space<vmem>>) attributes {dimension_semantics = [#tpu.dimension_semantics<parallel>], iteration_bounds = array<i64: 1>, scalar_prefetch = 0 : i64, scratch_operands = 0 : i64, tpu.core_type = #tpu.core_type<tc>, window_params = [{transform_indices = @transform_0, window_bounds = array<i64: 1, 2048>}, {transform_indices = @transform_1, window_bounds = array<i64: 1, 2048>}]} {
    %c0 = arith.constant 0 : index
    %c0_0 = arith.constant 0 : index
    %0 = vector.load %arg1[%c0, %c0_0] : memref<1x2048xf32, #tpu.memory_space<vmem>>, vector<1x2048xf32>
    %cst = arith.constant 0.000000e+00 : f32
    %1 = vector.broadcast %cst : f32 to vector<1x2048xf32>
    %2 = arith.maximumf %0, %1 : vector<1x2048xf32>
    %c0_1 = arith.constant 0 : index
    %c0_2 = arith.constant 0 : index
    %3 = vector.load %arg2[%c0_1, %c0_2] : memref<1x2048xf32, #tpu.memory_space<vmem>>, vector<1x2048xf32>
    tpu.vector_store %arg2[%c0_1, %c0_2], %2 {strides = array<i32>} : memref<1x2048xf32, #tpu.memory_space<vmem>>, vector<1x2048xf32>,
    return
  }
  func.func @transform_0(%arg0: i32) -> (i32, i32) {
    %c0_i32 = arith.constant 0 : i32
    %c0_i32_0 = arith.constant 0 : i32
    return %arg0, %c0_i32 : i32, i32
  }
  func.func @transform_1(%arg0: i32) -> (i32, i32) {
    %c0_i32 = arith.constant 0 : i32
    %c0_i32_0 = arith.constant 0 : i32
    return %arg0, %c0_i32 : i32, i32
  }
}

</mosaic_0001>

<bundles_post_ra>
// kernel: tpu_custom_call.1
= control target key start
LH: loop header
LB: loop body
LE: loop exit
PB: predicated region body
PF: predicated region fallthrough
CT: control target
= control target key end

     0   :  { %6 = vsyncpa [#allocation3], 0  ;;  %s128_s0 = inlined_call_operand.hbm [shape: f32[1,2048], index: 0, kind: input, shape index: {}]   ;;  %s129_s1 = inlined_call_operand.hbm [shape: f32[1,2048], index: 1, kind: output, shape index: {}]  }
   0x1   :  { %7 = vsyncpa [#allocation4], 0  ;;  %s92_s6 = smov [#allocation2]   ;;  %s44_s10 = scalar_lea.hbm %s128_s0, 256 }
   0x2   :  { %s14_s7 = sshll.u32 %s92_s6, 4  ;;  %p45_p0 = scmp.ne.s32.totalorder %s128_s0, %s44_s10  ;;  %s15_s7 = int_to_ptr.vmem [resolvable:$true] %s14_s7 }
   0x3   :  { %p48_p1 = scmp.lt.u32.totalorder %s44_s10, %s128_s0 }
   0x5   :  { %p50_p2 = pnand %p48_p1, %p45_p0 }
   0x7   :  { %53 = shalt.err (!%p50_p2)
}
   0x8   :  { %s54_s15 = scalar_lea.vmem %s15_s7, 256  ;;  %p59_p4 = scmp.lt.s32.totalorder %s15_s7, %s15_s7 }
   0x9   :  { %p55_p3 = scmp.ne.s32.totalorder %s15_s7, %s54_s15  ;;  %p60_p5 = scmp.lt.s32.totalorder %s54_s15, %s54_s15 }
   0xb   :  { %p61_p6 = por %p60_p5, %p59_p4 }
   0xd   :  { %p62_p7 = pnand %p61_p6, %p55_p3 }
   0xf   :  { %65 = shalt.err (!%p62_p7)
}
  0x10   :  { %17 = dma.hbm_to_vmem [thread:$0]  %s128_s0, 256, %s15_s7, [#allocation3]  }
  0x11   :  { %88 = dma.done.wait [#allocation3], 256  }
  0x12   :  { %89 = vsyncadd [#allocation3], 4294967040  ;;  %s93_s18 = smov [#allocation5]   ;;  %v21_v0 = vld [vmem:[#allocation2] sm:$0xff]  ;;  %v22_v1 = vld [vmem:[#allocation2 + $0x8] sm:$0xff] }
  0x13   :  { %s33_s19 = sshll.u32 %s93_s18, 4  ;;  %v23_v2 = vmax.f32 %v21_v0, 0.0  ;;  %v24_v3 = vmax.f32 %v22_v1, 0.0  ;;  %s34_s19 = int_to_ptr.vmem [resolvable:$true] %s33_s19 }
  0x14   :  { %s66_s20 = scalar_lea.vmem %s34_s19, 256  ;;  %p71_p9 = scmp.lt.s32.totalorder %s34_s19, %s34_s19 }
  0x15   :  { %25 = vst [vmem:[#allocation5] sm:$0xff] %v23_v2  ;;  %26 = vst [vmem:[#allocation5 + $0x8] sm:$0xff] %v24_v3  ;;  %p67_p8 = scmp.ne.s32.totalorder %s34_s19, %s66_s20  ;;  %p72_p10 = scmp.lt.s32.totalorder %s66_s20, %s66_s20 }
  0x17   :  { %p73_p11 = por %p72_p10, %p71_p9 }
  0x19   :  { %p74_p12 = pnand %p73_p11, %p67_p8 }
  0x1b   :  { %77 = shalt.err (!%p74_p12)
}
  0x1c   :  { %s78_s22 = scalar_lea.hbm %s129_s1, 256 }
  0x1d   :  { %p79_p13 = scmp.ne.s32.totalorder %s129_s1, %s78_s22  ;;  %p82_p0 = scmp.lt.u32.totalorder %s78_s22, %s129_s1 }
  0x1f   :  { %p84_p1 = pnand %p82_p0, %p79_p13 }
  0x21   :  { %87 = shalt.err (!%p84_p1)
}
  0x22   :  { %36 = dma.vmem_to_hbm [thread:$0]  %s34_s19, 256, %s129_s1, [#allocation4]  }
  0x23   :  { %90 = dma.done.wait [#allocation4], 256  }
  0x24   :  { %91 = vsyncadd [#allocation4], 4294967040 }
  0x25   :  { %40 = vsyncpa [#allocation3], 1 }
  0x26   :  { %41 = vsyncpa [#allocation4], 1 }

</bundles_post_ra>
